<compile_context>
chip_gen: v7x
topology: tpu7x:2x2x1
jax: 0.10.0
libtpu: 0.0.40
codegen_flags: <defaults>
</compile_context>

<pallas_src>
import functools

import jax
import jax.numpy as jnp
from jax.experimental import pallas as pl
from jax.experimental.pallas import tpu as pltpu


def _round_up(x: int, m: int) -> int:
    return ((x + m - 1) // m) * m


def _cdiv(a: int, b: int) -> int:
    return -(-a // b)


def make_forwardnet_kernel(hidden_pad: int, out_pad: int):
    """Builds the fused (Linear->ReLU)x5 -> Linear kernel with static padded widths."""

    def kernel(x_ref,
               w1_ref, w2_ref, w3_ref, w4_ref, w5_ref, w6_ref,
               b_ref, o_ref):
        hidden_w_refs = (w1_ref, w2_ref, w3_ref, w4_ref, w5_ref)
        h = x_ref[...]                                   # bf16 (tb, in_pad)
        for i, w_ref in enumerate(hidden_w_refs):
            # bf16 operands, f32 accumulation on the MXU.
            z = jnp.dot(h, w_ref[...], preferred_element_type=jnp.float32)
            # Static-row bias slice; the (1, pad) -> (tb, pad) broadcast is cheap.
            z = z + b_ref[pl.ds(i, 1), :hidden_pad]
            # ReLU on the VPU; keep a single bf16 copy live between layers.
            h = jnp.maximum(z, 0.0).astype(jnp.bfloat16)
        z = jnp.dot(h, w6_ref[...], preferred_element_type=jnp.float32)
        o_ref[...] = (z + b_ref[pl.ds(5, 1), :out_pad]).astype(o_ref.dtype)

    return kernel


def forwardnet_pallas(x, params, *, batch_tile: int = 512,
                      single_buffer_weights: bool = True,
                      out_dtype=jnp.float32):
    """Fused ForwardNet forward pass.

    x:      (batch, input_dim) float array.
    params: flat list [w1, b1, ..., w6, b6]; w_i: (in, out) f32, b_i: (out,) f32.
    """
    ws = params[0::2]
    bs = params[1::2]
    batch, in_dim = x.shape
    dims = [in_dim] + [int(w.shape[1]) for w in ws]        # [in, h, h, h, h, h, out]
    out_dim = dims[-1]

    # --- padded, lane/MXU-aligned feature dims (multiples of 128) ---
    pdims = [_round_up(d, 128) for d in dims]
    in_pad, hid_pad, out_pad = pdims[0], pdims[1], pdims[-1]
    pmax = max(pdims[1:])

    # --- batch tiling: tb multiple of 16 (bf16 sublane minimum); bound tail
    #     waste to <16 rows/tile instead of rounding up to a full batch_tile. ---
    bpad16 = _round_up(max(batch, 1), 16)
    n_tiles = _cdiv(bpad16, max(_round_up(batch_tile, 16), 16))
    if n_tiles == 1 and bpad16 >= 32:
        n_tiles = 2          # give v7x's second TensorCore something to do
    tb = _round_up(_cdiv(bpad16, n_tiles), 16)
    bpad = n_tiles * tb
    grid = (n_tiles,)

    # --- pad + cast operands (weights & activations -> bf16, biases stay f32) ---
    xp = jnp.zeros((bpad, in_pad), jnp.bfloat16)
    xp = xp.at[:batch, :in_dim].set(x.astype(jnp.bfloat16))

    wps = []
    for i, w in enumerate(ws):
        wp = jnp.zeros((pdims[i], pdims[i + 1]), jnp.bfloat16)
        wp = wp.at[:w.shape[0], :w.shape[1]].set(w.astype(jnp.bfloat16))
        wps.append(wp)

    bias_packed = jnp.zeros((8, pmax), jnp.float32)        # one (8,128k) tile, 1 DMA
    for i, b in enumerate(bs):
        bias_packed = bias_packed.at[i, :b.shape[-1]].set(
            b.reshape(-1).astype(jnp.float32))

    # --- specs: x/out tiled over batch (double-buffered); weights/bias resident
    #     with constant index_map and single-buffered (double-buffering a
    #     constant block buys nothing and doubles VMEM). ---
    resident_kwargs = {}
    if single_buffer_weights:
        resident_kwargs = dict(pipeline_mode=pl.Buffered(1))

    x_spec = pl.BlockSpec((tb, in_pad), lambda b: (b, 0))
    w_specs = [pl.BlockSpec((pdims[i], pdims[i + 1]), lambda b: (0, 0),
                            **resident_kwargs)
               for i in range(6)]
    b_spec = pl.BlockSpec((8, pmax), lambda b: (0, 0), **resident_kwargs)
    o_spec = pl.BlockSpec((tb, out_pad), lambda b: (b, 0))

    # --- VMEM budget (real now that resident operands are single-buffered) ---
    wbuf = 1 if single_buffer_weights else 2
    weight_bytes = wbuf * sum(int(w.size) * 2 for w in wps)
    bias_bytes = wbuf * int(bias_packed.size) * 4
    out_bytes_per_el = jnp.dtype(out_dtype).itemsize
    io_bytes = 2 * (tb * in_pad * 2 + tb * out_pad * out_bytes_per_el)
    act_bytes = 3 * tb * max(pdims) * 4                    # in-flight intermediates
    needed = weight_bytes + bias_bytes + io_bytes + act_bytes + (4 << 20)

    # Generation-aware cap: ~15% headroom for compiler-internal scratch
    # (~108 MiB on v5e/v6e's 128 MiB VMEM, ~54 MiB on v7x's 64 MiB).
    try:
        vmem_cap = int(pltpu.get_tpu_info().vmem_capacity_bytes)
    except Exception:
        vmem_cap = 64 << 20
    limit_cap = max(int(vmem_cap * 0.85), 16 << 20)
    vmem_limit = int(min(max(needed, 32 << 20), limit_cap))
    # TODO(synk): if `needed` exceeds `limit_cap` (very large hidden dims), fall
    # back to streaming weights over a layer/K grid axis instead of clamping.
    # TODO(synk): for a latency-bound serving loop, prefetch the weight tensors
    # via a cross-pallas_call future (P10) so the one-shot weight DMA is hidden.

    flops = 2 * bpad * sum(pdims[i] * pdims[i + 1] for i in range(6))
    bytes_accessed = (int(xp.size) * 2 + weight_bytes + bias_bytes
                      + bpad * out_pad * out_bytes_per_el)

    kernel = make_forwardnet_kernel(hid_pad, out_pad)

    out_padded = pl.pallas_call(
        kernel,
        out_shape=jax.ShapeDtypeStruct((bpad, out_pad), out_dtype),
        grid=grid,
        in_specs=[x_spec] + w_specs + [b_spec],
        out_specs=o_spec,
        compiler_params=pltpu.CompilerParams(
            dimension_semantics=("parallel",),
            vmem_limit_bytes=vmem_limit,
        ),
        cost_estimate=pl.CostEstimate(flops=flops, transcendentals=0,
                                      bytes_accessed=bytes_accessed),
    )(xp, *wps, bias_packed)

    return out_padded[:batch, :out_dim]


def init_params(key, input_dim, hidden_dim, output_dim):
    """Deterministic init mimicking nn.Linear (weights pre-transposed to (in, out))."""
    dims = [(input_dim, hidden_dim)] + [(hidden_dim, hidden_dim)] * 4 \
         + [(hidden_dim, output_dim)]
    params = []
    for (fan_in, fan_out) in dims:
        key, kw, kb = jax.random.split(key, 3)
        bound = 1.0 / (fan_in ** 0.5)   # PyTorch nn.Linear default init bound
        w = jax.random.uniform(kw, (fan_in, fan_out), jnp.float32, -bound, bound)
        b = jax.random.uniform(kb, (fan_out,), jnp.float32, -bound, bound)
        params += [w, b]
    return params


def forwardnet_ref(x, params, matmul_dtype=jnp.float32):
    """Plain-JAX reference; matmul_dtype=bfloat16 matches the kernel's MXU math."""
    h = x.astype(jnp.float32)
    for i in range(6):
        w = params[2 * i].astype(matmul_dtype)
        b = params[2 * i + 1].astype(jnp.float32).reshape(1, -1)
        h = jnp.dot(h.astype(matmul_dtype), w,
                    preferred_element_type=jnp.float32) + b
        if i < 5:
            h = jnp.maximum(h, 0.0)
    return h


if __name__ == "__main__":
    input_dim, hidden_dim, output_dim = 16, 32, 8
    batch = 4

    key = jax.random.PRNGKey(0)
    key, kx = jax.random.split(key)
    x = jax.random.normal(kx, (batch, input_dim), jnp.float32)
    params = init_params(key, input_dim, hidden_dim, output_dim)

    def run(**overrides):
        fwd = jax.jit(functools.partial(forwardnet_pallas, **overrides))
        return jax.block_until_ready(fwd(x, params))

    try:
        out = run()
    except Exception:
        # Safety net: if this JAX build rejects pl.Buffered(1) on the top-level
        # pipeline, fall back to default (double-buffered) resident weights.
        out = run(single_buffer_weights=False)

    ref_bf16 = forwardnet_ref(x, params, matmul_dtype=jnp.bfloat16)
    ref_f32 = forwardnet_ref(x, params, matmul_dtype=jnp.float32)

    assert out.shape == (batch, output_dim)
    # Tight check against a reference using identical bf16-operand / f32-accum math.
    assert jnp.allclose(out, ref_bf16, atol=1e-3, rtol=1e-3), (
        f"max abs err vs bf16 ref: {float(jnp.max(jnp.abs(out - ref_bf16)))}")
    # Loose sanity check against the full-f32 PyTorch-equivalent forward.
    assert jnp.allclose(out, ref_f32, atol=1e-1, rtol=1e-1), (
        f"max abs err vs f32 ref: {float(jnp.max(jnp.abs(out - ref_f32)))}")

    print("KERNEL_OK")
</pallas_src>

<mosaic_0001>
module attributes {stable_mosaic.version = 11 : i64} {
  func.func @kernel(%arg0: i32, %arg1: memref<16x128xbf16, #tpu.memory_space<vmem>>, %arg2: memref<128x128xbf16, #tpu.memory_space<vmem>>, %arg3: memref<128x128xbf16, #tpu.memory_space<vmem>>, %arg4: memref<128x128xbf16, #tpu.memory_space<vmem>>, %arg5: memref<128x128xbf16, #tpu.memory_space<vmem>>, %arg6: memref<128x128xbf16, #tpu.memory_space<vmem>>, %arg7: memref<128x128xbf16, #tpu.memory_space<vmem>>, %arg8: memref<8x128xf32, #tpu.memory_space<vmem>>, %arg9: memref<16x128xf32, #tpu.memory_space<vmem>>) attributes {dimension_semantics = [#tpu.dimension_semantics<parallel>], iteration_bounds = array<i64: 1>, scalar_prefetch = 0 : i64, scratch_operands = 0 : i64, tpu.core_type = #tpu.core_type<tc>, window_params = [{transform_indices = @transform_0, window_bounds = array<i64: 16, 128>}, {pipeline_mode = #tpu.pipeline_mode<synchronous>, transform_indices = @transform_1, window_bounds = array<i64: 128, 128>}, {pipeline_mode = #tpu.pipeline_mode<synchronous>, transform_indices = @transform_2, window_bounds = array<i64: 128, 128>}, {pipeline_mode = #tpu.pipeline_mode<synchronous>, transform_indices = @transform_3, window_bounds = array<i64: 128, 128>}, {pipeline_mode = #tpu.pipeline_mode<synchronous>, transform_indices = @transform_4, window_bounds = array<i64: 128, 128>}, {pipeline_mode = #tpu.pipeline_mode<synchronous>, transform_indices = @transform_5, window_bounds = array<i64: 128, 128>}, {pipeline_mode = #tpu.pipeline_mode<synchronous>, transform_indices = @transform_6, window_bounds = array<i64: 128, 128>}, {pipeline_mode = #tpu.pipeline_mode<synchronous>, transform_indices = @transform_7, window_bounds = array<i64: 8, 128>}, {transform_indices = @transform_8, window_bounds = array<i64: 16, 128>}]} {
    %c0 = arith.constant 0 : index
    %c0_0 = arith.constant 0 : index
    %0 = vector.load %arg1[%c0, %c0_0] : memref<16x128xbf16, #tpu.memory_space<vmem>>, vector<16x128xbf16>
    %c0_1 = arith.constant 0 : index
    %c0_2 = arith.constant 0 : index
    %1 = vector.load %arg2[%c0_1, %c0_2] : memref<128x128xbf16, #tpu.memory_space<vmem>>, vector<128x128xbf16>
    %cst = arith.constant dense<0.000000e+00> : vector<16x128xf32>
    %2 = tpu.matmul %0, %1, %cst {dimension_numbers = #tpu.dot_dimension_numbers<[1], [0], [0], [1], [0, 0, 1, 1], [], []>} : vector<16x128xbf16>, vector<128x128xbf16>, vector<16x128xf32> -> vector<16x128xf32>
    %c0_3 = arith.constant 0 : index
    %c0_4 = arith.constant 0 : index
    %3 = vector.load %arg8[%c0_3, %c0_4] : memref<8x128xf32, #tpu.memory_space<vmem>>, vector<1x128xf32>
    %4 = vector.broadcast %3 : vector<1x128xf32> to vector<16x128xf32>
    %5 = arith.addf %2, %4 : vector<16x128xf32>
    %cst_5 = arith.constant 0.000000e+00 : f32
    %6 = vector.broadcast %cst_5 : f32 to vector<16x128xf32>
    %7 = arith.maximumf %5, %6 : vector<16x128xf32>
    %8 = arith.truncf %7 : vector<16x128xf32> to vector<16x128xbf16>
    %c0_6 = arith.constant 0 : index
    %c0_7 = arith.constant 0 : index
    %9 = vector.load %arg3[%c0_6, %c0_7] : memref<128x128xbf16, #tpu.memory_space<vmem>>, vector<128x128xbf16>
    %cst_8 = arith.constant dense<0.000000e+00> : vector<16x128xf32>
    %10 = tpu.matmul %8, %9, %cst_8 {dimension_numbers = #tpu.dot_dimension_numbers<[1], [0], [0], [1], [0, 0, 1, 1], [], []>} : vector<16x128xbf16>, vector<128x128xbf16>, vector<16x128xf32> -> vector<16x128xf32>
    %c1 = arith.constant 1 : index
    %c0_9 = arith.constant 0 : index
    %11 = vector.load %arg8[%c1, %c0_9] : memref<8x128xf32, #tpu.memory_space<vmem>>, vector<1x128xf32>
    %12 = vector.broadcast %11 : vector<1x128xf32> to vector<16x128xf32>
    %13 = arith.addf %10, %12 : vector<16x128xf32>
    %cst_10 = arith.constant 0.000000e+00 : f32
    %14 = vector.broadcast %cst_10 : f32 to vector<16x128xf32>
    %15 = arith.maximumf %13, %14 : vector<16x128xf32>
    %16 = arith.truncf %15 : vector<16x128xf32> to vector<16x128xbf16>
    %c0_11 = arith.constant 0 : index
    %c0_12 = arith.constant 0 : index
    %17 = vector.load %arg4[%c0_11, %c0_12] : memref<128x128xbf16, #tpu.memory_space<vmem>>, vector<128x128xbf16>
    %cst_13 = arith.constant dense<0.000000e+00> : vector<16x128xf32>
    %18 = tpu.matmul %16, %17, %cst_13 {dimension_numbers = #tpu.dot_dimension_numbers<[1], [0], [0], [1], [0, 0, 1, 1], [], []>} : vector<16x128xbf16>, vector<128x128xbf16>, vector<16x128xf32> -> vector<16x128xf32>
    %c2 = arith.constant 2 : index
    %c0_14 = arith.constant 0 : index
    %19 = vector.load %arg8[%c2, %c0_14] : memref<8x128xf32, #tpu.memory_space<vmem>>, vector<1x128xf32>
    %20 = vector.broadcast %19 : vector<1x128xf32> to vector<16x128xf32>
    %21 = arith.addf %18, %20 : vector<16x128xf32>
    %cst_15 = arith.constant 0.000000e+00 : f32
    %22 = vector.broadcast %cst_15 : f32 to vector<16x128xf32>
    %23 = arith.maximumf %21, %22 : vector<16x128xf32>
    %24 = arith.truncf %23 : vector<16x128xf32> to vector<16x128xbf16>
    %c0_16 = arith.constant 0 : index
    %c0_17 = arith.constant 0 : index
    %25 = vector.load %arg5[%c0_16, %c0_17] : memref<128x128xbf16, #tpu.memory_space<vmem>>, vector<128x128xbf16>
    %cst_18 = arith.constant dense<0.000000e+00> : vector<16x128xf32>
    %26 = tpu.matmul %24, %25, %cst_18 {dimension_numbers = #tpu.dot_dimension_numbers<[1], [0], [0], [1], [0, 0, 1, 1], [], []>} : vector<16x128xbf16>, vector<128x128xbf16>, vector<16x128xf32> -> vector<16x128xf32>
    %c3 = arith.constant 3 : index
    %c0_19 = arith.constant 0 : index
    %27 = vector.load %arg8[%c3, %c0_19] : memref<8x128xf32, #tpu.memory_space<vmem>>, vector<1x128xf32>
    %28 = vector.broadcast %27 : vector<1x128xf32> to vector<16x128xf32>
    %29 = arith.addf %26, %28 : vector<16x128xf32>
    %cst_20 = arith.constant 0.000000e+00 : f32
    %30 = vector.broadcast %cst_20 : f32 to vector<16x128xf32>
    %31 = arith.maximumf %29, %30 : vector<16x128xf32>
    %32 = arith.truncf %31 : vector<16x128xf32> to vector<16x128xbf16>
    %c0_21 = arith.constant 0 : index
    %c0_22 = arith.constant 0 : index
    %33 = vector.load %arg6[%c0_21, %c0_22] : memref<128x128xbf16, #tpu.memory_space<vmem>>, vector<128x128xbf16>
    %cst_23 = arith.constant dense<0.000000e+00> : vector<16x128xf32>
    %34 = tpu.matmul %32, %33, %cst_23 {dimension_numbers = #tpu.dot_dimension_numbers<[1], [0], [0], [1], [0, 0, 1, 1], [], []>} : vector<16x128xbf16>, vector<128x128xbf16>, vector<16x128xf32> -> vector<16x128xf32>
    %c4 = arith.constant 4 : index
    %c0_24 = arith.constant 0 : index
    %35 = vector.load %arg8[%c4, %c0_24] : memref<8x128xf32, #tpu.memory_space<vmem>>, vector<1x128xf32>
    %36 = vector.broadcast %35 : vector<1x128xf32> to vector<16x128xf32>
    %37 = arith.addf %34, %36 : vector<16x128xf32>
    %cst_25 = arith.constant 0.000000e+00 : f32
    %38 = vector.broadcast %cst_25 : f32 to vector<16x128xf32>
    %39 = arith.maximumf %37, %38 : vector<16x128xf32>
    %40 = arith.truncf %39 : vector<16x128xf32> to vector<16x128xbf16>
    %c0_26 = arith.constant 0 : index
    %c0_27 = arith.constant 0 : index
    %41 = vector.load %arg7[%c0_26, %c0_27] : memref<128x128xbf16, #tpu.memory_space<vmem>>, vector<128x128xbf16>
    %cst_28 = arith.constant dense<0.000000e+00> : vector<16x128xf32>
    %42 = tpu.matmul %40, %41, %cst_28 {dimension_numbers = #tpu.dot_dimension_numbers<[1], [0], [0], [1], [0, 0, 1, 1], [], []>} : vector<16x128xbf16>, vector<128x128xbf16>, vector<16x128xf32> -> vector<16x128xf32>
    %c5 = arith.constant 5 : index
    %c0_29 = arith.constant 0 : index
    %43 = vector.load %arg8[%c5, %c0_29] : memref<8x128xf32, #tpu.memory_space<vmem>>, vector<1x128xf32>
    %44 = vector.broadcast %43 : vector<1x128xf32> to vector<16x128xf32>
    %45 = arith.addf %42, %44 : vector<16x128xf32>
    %c0_30 = arith.constant 0 : index
    %c0_31 = arith.constant 0 : index
    %46 = vector.load %arg9[%c0_30, %c0_31] : memref<16x128xf32, #tpu.memory_space<vmem>>, vector<16x128xf32>
    tpu.vector_store %arg9[%c0_30, %c0_31], %45 {strides = array<i32>} : memref<16x128xf32, #tpu.memory_space<vmem>>, vector<16x128xf32>,
    return
  }
  func.func @transform_0(%arg0: i32) -> (i32, i32) {
    %c0_i32 = arith.constant 0 : i32
    %c0_i32_0 = arith.constant 0 : i32
    return %arg0, %c0_i32 : i32, i32
  }
  func.func @transform_1(%arg0: i32) -> (i32, i32) {
    %c0_i32 = arith.constant 0 : i32
    %c0_i32_0 = arith.constant 0 : i32
    %c0_i32_1 = arith.constant 0 : i32
    return %c0_i32, %c0_i32_0 : i32, i32
  }
  func.func @transform_2(%arg0: i32) -> (i32, i32) {
    %c0_i32 = arith.constant 0 : i32
    %c0_i32_0 = arith.constant 0 : i32
    %c0_i32_1 = arith.constant 0 : i32
    return %c0_i32, %c0_i32_0 : i32, i32
  }
  func.func @transform_3(%arg0: i32) -> (i32, i32) {
    %c0_i32 = arith.constant 0 : i32
    %c0_i32_0 = arith.constant 0 : i32
    %c0_i32_1 = arith.constant 0 : i32
    return %c0_i32, %c0_i32_0 : i32, i32
  }
  func.func @transform_4(%arg0: i32) -> (i32, i32) {
    %c0_i32 = arith.constant 0 : i32
    %c0_i32_0 = arith.constant 0 : i32
    %c0_i32_1 = arith.constant 0 : i32
    return %c0_i32, %c0_i32_0 : i32, i32
  }
  func.func @transform_5(%arg0: i32) -> (i32, i32) {
    %c0_i32 = arith.constant 0 : i32
    %c0_i32_0 = arith.constant 0 : i32
    %c0_i32_1 = arith.constant 0 : i32
    return %c0_i32, %c0_i32_0 : i32, i32
  }
  func.func @transform_6(%arg0: i32) -> (i32, i32) {
    %c0_i32 = arith.constant 0 : i32
    %c0_i32_0 = arith.constant 0 : i32
    %c0_i32_1 = arith.constant 0 : i32
    return %c0_i32, %c0_i32_0 : i32, i32
  }
  func.func @transform_7(%arg0: i32) -> (i32, i32) {
    %c0_i32 = arith.constant 0 : i32
    %c0_i32_0 = arith.constant 0 : i32
    %c0_i32_1 = arith.constant 0 : i32
    return %c0_i32, %c0_i32_0 : i32, i32
  }
  func.func @transform_8(%arg0: i32) -> (i32, i32) {
    %c0_i32 = arith.constant 0 : i32
    %c0_i32_0 = arith.constant 0 : i32
    return %arg0, %c0_i32 : i32, i32
  }
}

module attributes {stable_mosaic.version = 11 : i64} {
  func.func @kernel(%arg0: i32, %arg1: memref<16x128xbf16, #tpu.memory_space<vmem>>, %arg2: memref<128x128xbf16, #tpu.memory_space<vmem>>, %arg3: memref<128x128xbf16, #tpu.memory_space<vmem>>, %arg4: memref<128x128xbf16, #tpu.memory_space<vmem>>, %arg5: memref<128x128xbf16, #tpu.memory_space<vmem>>, %arg6: memref<128x128xbf16, #tpu.memory_space<vmem>>, %arg7: memref<128x128xbf16, #tpu.memory_space<vmem>>, %arg8: memref<8x128xf32, #tpu.memory_space<vmem>>, %arg9: memref<16x128xf32, #tpu.memory_space<vmem>>) attributes {dimension_semantics = [#tpu.dimension_semantics<parallel>], iteration_bounds = array<i64: 1>, scalar_prefetch = 0 : i64, scratch_operands = 0 : i64, tpu.core_type = #tpu.core_type<tc>, window_params = [{transform_indices = @transform_0, window_bounds = array<i64: 16, 128>}, {pipeline_mode = #tpu.pipeline_mode<synchronous>, transform_indices = @transform_1, window_bounds = array<i64: 128, 128>}, {pipeline_mode = #tpu.pipeline_mode<synchronous>, transform_indices = @transform_2, window_bounds = array<i64: 128, 128>}, {pipeline_mode = #tpu.pipeline_mode<synchronous>, transform_indices = @transform_3, window_bounds = array<i64: 128, 128>}, {pipeline_mode = #tpu.pipeline_mode<synchronous>, transform_indices = @transform_4, window_bounds = array<i64: 128, 128>}, {pipeline_mode = #tpu.pipeline_mode<synchronous>, transform_indices = @transform_5, window_bounds = array<i64: 128, 128>}, {pipeline_mode = #tpu.pipeline_mode<synchronous>, transform_indices = @transform_6, window_bounds = array<i64: 128, 128>}, {pipeline_mode = #tpu.pipeline_mode<synchronous>, transform_indices = @transform_7, window_bounds = array<i64: 8, 128>}, {transform_indices = @transform_8, window_bounds = array<i64: 16, 128>}]} {
    %c0 = arith.constant 0 : index
    %c0_0 = arith.constant 0 : index
    %0 = vector.load %arg1[%c0, %c0_0] : memref<16x128xbf16, #tpu.memory_space<vmem>>, vector<16x128xbf16>
    %c0_1 = arith.constant 0 : index
    %c0_2 = arith.constant 0 : index
    %1 = vector.load %arg2[%c0_1, %c0_2] : memref<128x128xbf16, #tpu.memory_space<vmem>>, vector<128x128xbf16>
    %cst = arith.constant dense<0.000000e+00> : vector<16x128xf32>
    %2 = tpu.matmul %0, %1, %cst {dimension_numbers = #tpu.dot_dimension_numbers<[1], [0], [0], [1], [0, 0, 1, 1], [], []>} : vector<16x128xbf16>, vector<128x128xbf16>, vector<16x128xf32> -> vector<16x128xf32>
    %c0_3 = arith.constant 0 : index
    %c0_4 = arith.constant 0 : index
    %3 = vector.load %arg8[%c0_3, %c0_4] : memref<8x128xf32, #tpu.memory_space<vmem>>, vector<1x128xf32>
    %4 = vector.broadcast %3 : vector<1x128xf32> to vector<16x128xf32>
    %5 = arith.addf %2, %4 : vector<16x128xf32>
    %cst_5 = arith.constant 0.000000e+00 : f32
    %6 = vector.broadcast %cst_5 : f32 to vector<16x128xf32>
    %7 = arith.maximumf %5, %6 : vector<16x128xf32>
    %8 = arith.truncf %7 : vector<16x128xf32> to vector<16x128xbf16>
    %c0_6 = arith.constant 0 : index
    %c0_7 = arith.constant 0 : index
    %9 = vector.load %arg3[%c0_6, %c0_7] : memref<128x128xbf16, #tpu.memory_space<vmem>>, vector<128x128xbf16>
    %cst_8 = arith.constant dense<0.000000e+00> : vector<16x128xf32>
    %10 = tpu.matmul %8, %9, %cst_8 {dimension_numbers = #tpu.dot_dimension_numbers<[1], [0], [0], [1], [0, 0, 1, 1], [], []>} : vector<16x128xbf16>, vector<128x128xbf16>, vector<16x128xf32> -> vector<16x128xf32>
    %c1 = arith.constant 1 : index
    %c0_9 = arith.constant 0 : index
    %11 = vector.load %arg8[%c1, %c0_9] : memref<8x128xf32, #tpu.memory_space<vmem>>, vector<1x128xf32>
    %12 = vector.broadcast %11 : vector<1x128xf32> to vector<16x128xf32>
    %13 = arith.addf %10, %12 : vector<16x128xf32>
    %cst_10 = arith.constant 0.000000e+00 : f32
    %14 = vector.broadcast %cst_10 : f32 to vector<16x128xf32>
    %15 = arith.maximumf %13, %14 : vector<16x128xf32>
    %16 = arith.truncf %15 : vector<16x128xf32> to vector<16x128xbf16>
    %c0_11 = arith.constant 0 : index
    %c0_12 = arith.constant 0 : index
    %17 = vector.load %arg4[%c0_11, %c0_12] : memref<128x128xbf16, #tpu.memory_space<vmem>>, vector<128x128xbf16>
    %cst_13 = arith.constant dense<0.000000e+00> : vector<16x128xf32>
    %18 = tpu.matmul %16, %17, %cst_13 {dimension_numbers = #tpu.dot_dimension_numbers<[1], [0], [0], [1], [0, 0, 1, 1], [], []>} : vector<16x128xbf16>, vector<128x128xbf16>, vector<16x128xf32> -> vector<16x128xf32>
    %c2 = arith.constant 2 : index
    %c0_14 = arith.constant 0 : index
    %19 = vector.load %arg8[%c2, %c0_14] : memref<8x128xf32, #tpu.memory_space<vmem>>, vector<1x128xf32>
    %20 = vector.broadcast %19 : vector<1x128xf32> to vector<16x128xf32>
    %21 = arith.addf %18, %20 : vector<16x128xf32>
    %cst_15 = arith.constant 0.000000e+00 : f32
    %22 = vector.broadcast %cst_15 : f32 to vector<16x128xf32>
    %23 = arith.maximumf %21, %22 : vector<16x128xf32>
    %24 = arith.truncf %23 : vector<16x128xf32> to vector<16x128xbf16>
    %c0_16 = arith.constant 0 : index
    %c0_17 = arith.constant 0 : index
    %25 = vector.load %arg5[%c0_16, %c0_17] : memref<128x128xbf16, #tpu.memory_space<vmem>>, vector<128x128xbf16>
    %cst_18 = arith.constant dense<0.000000e+00> : vector<16x128xf32>
    %26 = tpu.matmul %24, %25, %cst_18 {dimension_numbers = #tpu.dot_dimension_numbers<[1], [0], [0], [1], [0, 0, 1, 1], [], []>} : vector<16x128xbf16>, vector<128x128xbf16>, vector<16x128xf32> -> vector<16x128xf32>
    %c3 = arith.constant 3 : index
    %c0_19 = arith.constant 0 : index
    %27 = vector.load %arg8[%c3, %c0_19] : memref<8x128xf32, #tpu.memory_space<vmem>>, vector<1x128xf32>
    %28 = vector.broadcast %27 : vector<1x128xf32> to vector<16x128xf32>
    %29 = arith.addf %26, %28 : vector<16x128xf32>
    %cst_20 = arith.constant 0.000000e+00 : f32
    %30 = vector.broadcast %cst_20 : f32 to vector<16x128xf32>
    %31 = arith.maximumf %29, %30 : vector<16x128xf32>
    %32 = arith.truncf %31 : vector<16x128xf32> to vector<16x128xbf16>
    %c0_21 = arith.constant 0 : index
    %c0_22 = arith.constant 0 : index
    %33 = vector.load %arg6[%c0_21, %c0_22] : memref<128x128xbf16, #tpu.memory_space<vmem>>, vector<128x128xbf16>
    %cst_23 = arith.constant dense<0.000000e+00> : vector<16x128xf32>
    %34 = tpu.matmul %32, %33, %cst_23 {dimension_numbers = #tpu.dot_dimension_numbers<[1], [0], [0], [1], [0, 0, 1, 1], [], []>} : vector<16x128xbf16>, vector<128x128xbf16>, vector<16x128xf32> -> vector<16x128xf32>
    %c4 = arith.constant 4 : index
    %c0_24 = arith.constant 0 : index
    %35 = vector.load %arg8[%c4, %c0_24] : memref<8x128xf32, #tpu.memory_space<vmem>>, vector<1x128xf32>
    %36 = vector.broadcast %35 : vector<1x128xf32> to vector<16x128xf32>
    %37 = arith.addf %34, %36 : vector<16x128xf32>
    %cst_25 = arith.constant 0.000000e+00 : f32
    %38 = vector.broadcast %cst_25 : f32 to vector<16x128xf32>
    %39 = arith.maximumf %37, %38 : vector<16x128xf32>
    %40 = arith.truncf %39 : vector<16x128xf32> to vector<16x128xbf16>
    %c0_26 = arith.constant 0 : index
    %c0_27 = arith.constant 0 : index
    %41 = vector.load %arg7[%c0_26, %c0_27] : memref<128x128xbf16, #tpu.memory_space<vmem>>, vector<128x128xbf16>
    %cst_28 = arith.constant dense<0.000000e+00> : vector<16x128xf32>
    %42 = tpu.matmul %40, %41, %cst_28 {dimension_numbers = #tpu.dot_dimension_numbers<[1], [0], [0], [1], [0, 0, 1, 1], [], []>} : vector<16x128xbf16>, vector<128x128xbf16>, vector<16x128xf32> -> vector<16x128xf32>
    %c5 = arith.constant 5 : index
    %c0_29 = arith.constant 0 : index
    %43 = vector.load %arg8[%c5, %c0_29] : memref<8x128xf32, #tpu.memory_space<vmem>>, vector<1x128xf32>
    %44 = vector.broadcast %43 : vector<1x128xf32> to vector<16x128xf32>
    %45 = arith.addf %42, %44 : vector<16x128xf32>
    %c0_30 = arith.constant 0 : index
    %c0_31 = arith.constant 0 : index
    %46 = vector.load %arg9[%c0_30, %c0_31] : memref<16x128xf32, #tpu.memory_space<vmem>>, vector<16x128xf32>
    tpu.vector_store %arg9[%c0_30, %c0_31], %45 {strides = array<i32>} : memref<16x128xf32, #tpu.memory_space<vmem>>, vector<16x128xf32>,
    return
  }
  func.func @transform_0(%arg0: i32) -> (i32, i32) {
    %c0_i32 = arith.constant 0 : i32
    %c0_i32_0 = arith.constant 0 : i32
    return %arg0, %c0_i32 : i32, i32
  }
  func.func @transform_1(%arg0: i32) -> (i32, i32) {
    %c0_i32 = arith.constant 0 : i32
    %c0_i32_0 = arith.constant 0 : i32
    %c0_i32_1 = arith.constant 0 : i32
    return %c0_i32, %c0_i32_0 : i32, i32
  }
  func.func @transform_2(%arg0: i32) -> (i32, i32) {
    %c0_i32 = arith.constant 0 : i32
    %c0_i32_0 = arith.constant 0 : i32
    %c0_i32_1 = arith.constant 0 : i32
    return %c0_i32, %c0_i32_0 : i32, i32
  }
  func.func @transform_3(%arg0: i32) -> (i32, i32) {
    %c0_i32 = arith.constant 0 : i32
    %c0_i32_0 = arith.constant 0 : i32
    %c0_i32_1 = arith.constant 0 : i32
    return %c0_i32, %c0_i32_0 : i32, i32
  }
  func.func @transform_4(%arg0: i32) -> (i32, i32) {
    %c0_i32 = arith.constant 0 : i32
    %c0_i32_0 = arith.constant 0 : i32
    %c0_i32_1 = arith.constant 0 : i32
    return %c0_i32, %c0_i32_0 : i32, i32
  }
  func.func @transform_5(%arg0: i32) -> (i32, i32) {
    %c0_i32 = arith.constant 0 : i32
    %c0_i32_0 = arith.constant 0 : i32
    %c0_i32_1 = arith.constant 0 : i32
    return %c0_i32, %c0_i32_0 : i32, i32
  }
  func.func @transform_6(%arg0: i32) -> (i32, i32) {
    %c0_i32 = arith.constant 0 : i32
    %c0_i32_0 = arith.constant 0 : i32
    %c0_i32_1 = arith.constant 0 : i32
    return %c0_i32, %c0_i32_0 : i32, i32
  }
  func.func @transform_7(%arg0: i32) -> (i32, i32) {
    %c0_i32 = arith.constant 0 : i32
    %c0_i32_0 = arith.constant 0 : i32
    %c0_i32_1 = arith.constant 0 : i32
    return %c0_i32, %c0_i32_0 : i32, i32
  }
  func.func @transform_8(%arg0: i32) -> (i32, i32) {
    %c0_i32 = arith.constant 0 : i32
    %c0_i32_0 = arith.constant 0 : i32
    return %arg0, %c0_i32 : i32, i32
  }
}

</mosaic_0001>

<bundles_post_ra>
// kernel: forwardnet_pallas.1
= control target key start
LH: loop header
LB: loop body
LE: loop exit
PB: predicated region body
PF: predicated region fallthrough
CT: control target
= control target key end

     0   :  { %v999_v0 = vmov 0.0   ;;  %vm1000_vm0 = vmmov 0   ;;  %s1277_s1 = inlined_call_operand.vmem [shape: bf16[128,128], index: 1, kind: input, shape index: {}]   ;;  %s1278_s2 = inlined_call_operand.vmem [shape: bf16[128,128], index: 2, kind: input, shape index: {}]   ;;  %s1279_s0 = inlined_call_operand.vmem [shape: bf16[16,128], index: 0, kind: input, shape index: {}]   ;;  %s1280_s3 = inlined_call_operand.vmem [shape: bf16[128,128], index: 3, kind: input, shape index: {}]   ;;  %s1281_s7 = inlined_call_operand.vmem [shape: f32[8,128], index: 7, kind: input, shape index: {}]   ;;  %s1282_s4 = inlined_call_operand.vmem [shape: bf16[128,128], index: 4, kind: input, shape index: {}]   ;;  %s1283_s5 = inlined_call_operand.vmem [shape: bf16[128,128], index: 5, kind: input, shape index: {}]   ;;  %s1284_s6 = inlined_call_operand.vmem [shape: bf16[128,128], index: 6, kind: input, shape index: {}]   ;;  %s1285_s8 = inlined_call_operand.vmem [shape: f32[16,128], index: 8, kind: output, shape index: {}]  }
   0x1   :  { %828 = vmatprep.subr.bf16.mxu0 %v999_v0  ;;  %v950_v1 = vld [vmem:[%s1277_s1] sm:$0xff]   ;;  %844 = vmatprep.mubr.msk.bf16.mxu0 %vm1000_vm0, %v999_v0  ;;  %v951_v2 = vld [vmem:[%s1277_s1 + $0x8] sm:$0xff]   ;;  %v952_v3 = vld [vmem:[%s1277_s1 + $0x10] sm:$0xff]  }
   0x2   :  { %848 = vmatprep.subr.bf16.mxu1 %v999_v0  ;;  %864 = vmatprep.mubr.msk.bf16.mxu1 %vm1000_vm0, %v999_v0  ;;  %v959_v4 = vld [vmem:[%s1278_s2] sm:$0xff]   ;;  %v953_v5 = vld [vmem:[%s1277_s1 + $0x18] sm:$0xff]   ;;  %v960_v6 = vld [vmem:[%s1278_s2 + $0x8] sm:$0xff]  }
   0x3   :  { %829 = vmatpush3.bf16.msra.mxu0 %v950_v1  ;;  %849 = vmatpush3.bf16.msra.mxu1 %v959_v4  ;;  %v954_v7 = vld [vmem:[%s1277_s1 + $0x20] sm:$0xff]   ;;  %v961_v8 = vld [vmem:[%s1278_s2 + $0x10] sm:$0xff]   ;;  %v955_v9 = vld [vmem:[%s1277_s1 + $0x28] sm:$0xff]  }
   0x4   :  { %830 = vmatprep.subr.bf16.mxu0 %v999_v0  ;;  %850 = vmatprep.subr.bf16.mxu1 %v999_v0  ;;  %v962_v10 = vld [vmem:[%s1278_s2 + $0x18] sm:$0xff]   ;;  %v956_v11 = vld [vmem:[%s1277_s1 + $0x30] sm:$0xff]   ;;  %v963_v12 = vld [vmem:[%s1278_s2 + $0x20] sm:$0xff]  }
   0x5   :  { %v957_v13 = vld [vmem:[%s1277_s1 + $0x38] sm:$0xff]   ;;  %v964_v14 = vld [vmem:[%s1278_s2 + $0x28] sm:$0xff]   ;;  %v958_v15 = vld [vmem:[%s1279_s0] sm:$0xff]  }
   0x6   :  { %v965_v16 = vld [vmem:[%s1278_s2 + $0x30] sm:$0xff]   ;;  %v966_v17 = vld [vmem:[%s1278_s2 + $0x38] sm:$0xff]   ;;  %v967_v18 = vld [vmem:[%s1280_s3] sm:$0xff]  }
   0x7   :  { %831 = vmatpush3.bf16.msra.mxu0 %v951_v2  ;;  %851 = vmatpush3.bf16.msra.mxu1 %v960_v6  ;;  %v968_v19 = vld [vmem:[%s1280_s3 + $0x8] sm:$0xff]   ;;  %v969_v20 = vld [vmem:[%s1280_s3 + $0x10] sm:$0xff]   ;;  %v970_v21 = vld [vmem:[%s1280_s3 + $0x18] sm:$0xff]  }
   0x8   :  { %832 = vmatprep.subr.bf16.mxu0 %v999_v0  ;;  %852 = vmatprep.subr.bf16.mxu1 %v999_v0  ;;  %v971_v22 = vld [vmem:[%s1280_s3 + $0x20] sm:$0xff]   ;;  %v972_v23 = vld [vmem:[%s1280_s3 + $0x28] sm:$0xff]   ;;  %v973_v34 = vld [vmem:[%s1280_s3 + $0x30] sm:$0xff]  }
   0x9   :  { %v719_v24 = vld [vmem:[%s1281_s7] ss:$0 sm:$0xff]  ;;  %v974_v35 = vld [vmem:[%s1280_s3 + $0x38] sm:$0xff]   ;;  %v976_v37 = vld [vmem:[%s1282_s4 + $0x8] sm:$0xff]  }
   0xa   :  { %v975_v36 = vld [vmem:[%s1282_s4] sm:$0xff]   ;;  %v977_v38 = vld [vmem:[%s1282_s4 + $0x10] sm:$0xff]   ;;  %v978_v39 = vld [vmem:[%s1282_s4 + $0x18] sm:$0xff]  }
   0xb   :  { %833 = vmatpush3.bf16.msra.mxu0 %v952_v3  ;;  %853 = vmatpush3.bf16.msra.mxu1 %v961_v8  ;;  %v979_v40 = vld [vmem:[%s1282_s4 + $0x20] sm:$0xff]   ;;  %v980_v41 = vld [vmem:[%s1282_s4 + $0x28] sm:$0xff]   ;;  %v981_v52 = vld [vmem:[%s1282_s4 + $0x30] sm:$0xff]  }
   0xc   :  { %834 = vmatprep.subr.bf16.mxu0 %v999_v0  ;;  %854 = vmatprep.subr.bf16.mxu1 %v999_v0  ;;  %v729_v42 = vld [vmem:[%s1281_s7 + $0x1] ss:$0 sm:$0xff]  ;;  %v982_v53 = vld [vmem:[%s1282_s4 + $0x38] sm:$0xff]   ;;  %v984_v55 = vld [vmem:[%s1283_s5 + $0x8] sm:$0xff]  }
   0xd   :  { %v983_v54 = vld [vmem:[%s1283_s5] sm:$0xff]   ;;  %v985_v56 = vld [vmem:[%s1283_s5 + $0x10] sm:$0xff]   ;;  %v986_v57 = vld [vmem:[%s1283_s5 + $0x18] sm:$0xff]  }
   0xe   :  { %v987_v58 = vld [vmem:[%s1283_s5 + $0x20] sm:$0xff]   ;;  %v988_v59 = vld [vmem:[%s1283_s5 + $0x28] sm:$0xff]   ;;  %v990_v8 = vld [vmem:[%s1283_s5 + $0x38] sm:$0xff]  }
   0xf   :  { %835 = vmatpush3.bf16.msra.mxu0 %v953_v5  ;;  %855 = vmatpush3.bf16.msra.mxu1 %v962_v10  ;;  %v738_v60 = vld [vmem:[%s1281_s7 + $0x2] ss:$0 sm:$0xff]  ;;  %v992_v10 = vld [vmem:[%s1284_s6 + $0x8] sm:$0xff]  }
  0x10   :  { %836 = vmatprep.subr.bf16.mxu0 %v999_v0  ;;  %856 = vmatprep.subr.bf16.mxu1 %v999_v0 }
  0x13   :  { %837 = vmatpush3.bf16.msra.mxu0 %v954_v7  ;;  %857 = vmatpush3.bf16.msra.mxu1 %v963_v12  ;;  %v989_v7 = vld [vmem:[%s1283_s5 + $0x30] sm:$0xff]   ;;  %v994_v12 = vld [vmem:[%s1284_s6 + $0x18] sm:$0xff]  }
  0x14   :  { %838 = vmatprep.subr.bf16.mxu0 %v999_v0  ;;  %858 = vmatprep.subr.bf16.mxu1 %v999_v0 }
  0x17   :  { %839 = vmatpush3.bf16.msra.mxu0 %v955_v9  ;;  %859 = vmatpush3.bf16.msra.mxu1 %v964_v14  ;;  %v991_v9 = vld [vmem:[%s1284_s6] sm:$0xff]   ;;  %v996_v14 = vld [vmem:[%s1284_s6 + $0x28] sm:$0xff]  }
  0x18   :  { %840 = vmatprep.subr.bf16.mxu0 %v999_v0  ;;  %860 = vmatprep.subr.bf16.mxu1 %v999_v0 }
  0x1b   :  { %841 = vmatpush3.bf16.msra.mxu0 %v956_v11  ;;  %861 = vmatpush3.bf16.msra.mxu1 %v965_v16  ;;  %v993_v11 = vld [vmem:[%s1284_s6 + $0x10] sm:$0xff]  }
  0x1c   :  { %842 = vmatprep.subr.bf16.mxu0 %v999_v0  ;;  %862 = vmatprep.subr.bf16.mxu1 %v999_v0 }
  0x1f   :  { %843 = vmatpush3.bf16.msra.mxu0 %v957_v13  ;;  %863 = vmatpush3.bf16.msra.mxu1 %v966_v17  ;;  %v995_v13 = vld [vmem:[%s1284_s6 + $0x20] sm:$0xff]  }
  0x20   :  { %868 = vmatprep.subr.bf16.mxu0 %v999_v0  ;;  %888 = vmatprep.subr.bf16.mxu1 %v999_v0 }
  0x22   :  { %845 = vmatmul.mubr.bf16.vlgmr.msra.gmra.mrb[0].mxu0 %v958_v15  ;;  %v747_v15 = vld [vmem:[%s1281_s7 + $0x3] ss:$0 sm:$0xff] }
  0x23   :  { %884 = vmatprep.mubr.msk.bf16.mxu0 %vm1000_vm0, %v999_v0  ;;  %869 = vmatpush3.bf16.msra.mxu0 %v967_v18 }
  0x24   :  { %870 = vmatprep.subr.bf16.mxu0 %v999_v0 }
  0x27   :  { %871 = vmatpush3.bf16.msra.mxu0 %v968_v19 }
  0x28   :  { %872 = vmatprep.subr.bf16.mxu0 %v999_v0 }
  0x2b   :  { %873 = vmatpush3.bf16.msra.mxu0 %v969_v20 }
  0x2c   :  { %874 = vmatprep.subr.bf16.mxu0 %v999_v0 }
  0x2f   :  { %875 = vmatpush3.bf16.msra.mxu0 %v970_v21 }
  0x30   :  { %876 = vmatprep.subr.bf16.mxu0 %v999_v0 }
  0x33   :  { %877 = vmatpush3.bf16.msra.mxu0 %v971_v22 }
  0x34   :  { %878 = vmatprep.subr.bf16.mxu0 %v999_v0 }
  0x37   :  { %879 = vmatpush3.bf16.msra.mxu0 %v972_v23 }
  0x38   :  { %880 = vmatprep.subr.bf16.mxu0 %v999_v0 }
  0x3b   :  { %881 = vmatpush3.bf16.msra.mxu0 %v973_v34 }
  0x3c   :  { %882 = vmatprep.subr.bf16.mxu0 %v999_v0 }
  0x3f   :  { %883 = vmatpush3.bf16.msra.mxu0 %v974_v35 }
  0x40   :  { %908 = vmatprep.subr.bf16.mxu0 %v999_v0 }
  0xf5   :  { %v141_v25 = vpop.f32.mrb[0].mxu0 }
  0xf6   :  { %v142_v26 = vadd.f32 %v719_v24, %v141_v25  ;;  %v846_v27 = vpop.f32.mrb[1].mxu0  ;;  %v997_v25 = vld [vmem:[%s1284_s6 + $0x30] sm:$0xff]  }
  0xf7   :  { %v144_v28 = vpop.f32.mrb[2].mxu0  ;;  %v756_v27 = vld [vmem:[%s1281_s7 + $0x4] ss:$0 sm:$0xff] }
  0xf8   :  { %v145_v29 = vadd.f32 %v719_v24, %v144_v28  ;;  %v847_v30 = vpop.f32.mrb[3].mxu0  ;;  %v148_v31 = vmax.f32 %v142_v26, 0.0  ;;  %v998_v26 = vld [vmem:[%s1284_s6 + $0x38] sm:$0xff]  }
  0xfa   :  { %v149_v32 = vmax.f32 %v145_v29, 0.0 }
  0xfc   :  { %v150_v33 = vpack.c.bf16 %v149_v32, %v148_v31 }
  0xfe   :  { %865 = vmatmul.mubr.bf16.vlgmr.msra.gmra.mrb[0].mxu1 %v150_v33 }
  0xff   :  { %904 = vmatprep.mubr.msk.bf16.mxu1 %vm1000_vm0, %v999_v0  ;;  %889 = vmatpush3.bf16.msra.mxu1 %v975_v36 }
 0x100   :  { %890 = vmatprep.subr.bf16.mxu1 %v999_v0 }
 0x103   :  { %891 = vmatpush3.bf16.msra.mxu1 %v976_v37 }
 0x104   :  { %892 = vmatprep.subr.bf16.mxu1 %v999_v0 }
 0x107   :  { %893 = vmatpush3.bf16.msra.mxu1 %v977_v38 }
 0x108   :  { %894 = vmatprep.subr.bf16.mxu1 %v999_v0 }
 0x10b   :  { %895 = vmatpush3.bf16.msra.mxu1 %v978_v39 }
 0x10c   :  { %896 = vmatprep.subr.bf16.mxu1 %v999_v0 }
 0x10f   :  { %897 = vmatpush3.bf16.msra.mxu1 %v979_v40 }
 0x110   :  { %898 = vmatprep.subr.bf16.mxu1 %v999_v0 }
 0x113   :  { %899 = vmatpush3.bf16.msra.mxu1 %v980_v41 }
 0x114   :  { %900 = vmatprep.subr.bf16.mxu1 %v999_v0 }
 0x117   :  { %901 = vmatpush3.bf16.msra.mxu1 %v981_v52 }
 0x118   :  { %902 = vmatprep.subr.bf16.mxu1 %v999_v0 }
 0x11b   :  { %903 = vmatpush3.bf16.msra.mxu1 %v982_v53 }
 0x11c   :  { %928 = vmatprep.subr.bf16.mxu1 %v999_v0 }
 0x1d1   :  { %v254_v43 = vpop.f32.mrb[0].mxu1 }
 0x1d2   :  { %v255_v44 = vadd.f32 %v729_v42, %v254_v43  ;;  %v866_v45 = vpop.f32.mrb[1].mxu1 }
 0x1d3   :  { %v257_v46 = vpop.f32.mrb[2].mxu1 }
 0x1d4   :  { %v258_v47 = vadd.f32 %v729_v42, %v257_v46  ;;  %v867_v48 = vpop.f32.mrb[3].mxu1  ;;  %v261_v49 = vmax.f32 %v255_v44, 0.0 }
 0x1d6   :  { %v262_v50 = vmax.f32 %v258_v47, 0.0 }
 0x1d8   :  { %v263_v51 = vpack.c.bf16 %v262_v50, %v261_v49 }
 0x1da   :  { %885 = vmatmul.mubr.bf16.vlgmr.msra.gmra.mrb[4].mxu0 %v263_v51 }
 0x1db   :  { %924 = vmatprep.mubr.msk.bf16.mxu0 %vm1000_vm0, %v999_v0  ;;  %909 = vmatpush3.bf16.msra.mxu0 %v983_v54 }
 0x1dc   :  { %910 = vmatprep.subr.bf16.mxu0 %v999_v0 }
 0x1df   :  { %911 = vmatpush3.bf16.msra.mxu0 %v984_v55 }
 0x1e0   :  { %912 = vmatprep.subr.bf16.mxu0 %v999_v0 }
 0x1e3   :  { %913 = vmatpush3.bf16.msra.mxu0 %v985_v56 }
 0x1e4   :  { %914 = vmatprep.subr.bf16.mxu0 %v999_v0 }
 0x1e7   :  { %915 = vmatpush3.bf16.msra.mxu0 %v986_v57 }
 0x1e8   :  { %916 = vmatprep.subr.bf16.mxu0 %v999_v0 }
 0x1eb   :  { %917 = vmatpush3.bf16.msra.mxu0 %v987_v58 }
 0x1ec   :  { %918 = vmatprep.subr.bf16.mxu0 %v999_v0 }
 0x1ef   :  { %919 = vmatpush3.bf16.msra.mxu0 %v988_v59 }
 0x1f0   :  { %920 = vmatprep.subr.bf16.mxu0 %v999_v0 }
 0x1f3   :  { %921 = vmatpush3.bf16.msra.mxu0 %v989_v7 }
 0x1f4   :  { %922 = vmatprep.subr.bf16.mxu0 %v999_v0 }
 0x1f7   :  { %923 = vmatpush3.bf16.msra.mxu0 %v990_v8 }
 0x2ad   :  { %v367_v61 = vpop.f32.mrb[4].mxu0 }
 0x2ae   :  { %v368_v62 = vadd.f32 %v738_v60, %v367_v61  ;;  %v886_v63 = vpop.f32.mrb[5].mxu0 }
 0x2af   :  { %v370_v1 = vpop.f32.mrb[6].mxu0 }
 0x2b0   :  { %v371_v2 = vadd.f32 %v738_v60, %v370_v1  ;;  %v887_v3 = vpop.f32.mrb[7].mxu0  ;;  %v374_v4 = vmax.f32 %v368_v62, 0.0 }
 0x2b2   :  { %v375_v5 = vmax.f32 %v371_v2, 0.0 }
 0x2b4   :  { %v376_v6 = vpack.c.bf16 %v375_v5, %v374_v4 }
 0x2b6   :  { %905 = vmatmul.mubr.bf16.vlgmr.msra.gmra.mrb[4].mxu1 %v376_v6 }
 0x2b7   :  { %944 = vmatprep.mubr.msk.bf16.mxu1 %vm1000_vm0, %v999_v0  ;;  %929 = vmatpush3.bf16.msra.mxu1 %v991_v9 }
 0x2b8   :  { %930 = vmatprep.subr.bf16.mxu1 %v999_v0 }
 0x2bb   :  { %931 = vmatpush3.bf16.msra.mxu1 %v992_v10 }
 0x2bc   :  { %932 = vmatprep.subr.bf16.mxu1 %v999_v0 }
 0x2bf   :  { %933 = vmatpush3.bf16.msra.mxu1 %v993_v11 }
 0x2c0   :  { %934 = vmatprep.subr.bf16.mxu1 %v999_v0 }
 0x2c3   :  { %935 = vmatpush3.bf16.msra.mxu1 %v994_v12 }
 0x2c4   :  { %936 = vmatprep.subr.bf16.mxu1 %v999_v0 }
 0x2c7   :  { %937 = vmatpush3.bf16.msra.mxu1 %v995_v13 }
 0x2c8   :  { %938 = vmatprep.subr.bf16.mxu1 %v999_v0 }
 0x2cb   :  { %939 = vmatpush3.bf16.msra.mxu1 %v996_v14 }
 0x2cc   :  { %940 = vmatprep.subr.bf16.mxu1 %v999_v0 }
 0x2cf   :  { %941 = vmatpush3.bf16.msra.mxu1 %v997_v25 }
 0x2d0   :  { %942 = vmatprep.subr.bf16.mxu1 %v999_v0  ;;  %v765_v0 = vld [vmem:[%s1281_s7 + $0x5] ss:$0 sm:$0xff] }
 0x2d3   :  { %943 = vmatpush3.bf16.msra.mxu1 %v998_v26 }
 0x389   :  { %v480_v16 = vpop.f32.mrb[4].mxu1 }
 0x38a   :  { %v481_v17 = vadd.f32 %v747_v15, %v480_v16  ;;  %v906_v18 = vpop.f32.mrb[5].mxu1 }
 0x38b   :  { %v483_v19 = vpop.f32.mrb[6].mxu1 }
 0x38c   :  { %v484_v20 = vadd.f32 %v747_v15, %v483_v19  ;;  %v907_v21 = vpop.f32.mrb[7].mxu1  ;;  %v487_v22 = vmax.f32 %v481_v17, 0.0 }
 0x38e   :  { %v488_v23 = vmax.f32 %v484_v20, 0.0 }
 0x390   :  { %v489_v24 = vpack.c.bf16 %v488_v23, %v487_v22 }
 0x392   :  { %925 = vmatmul.mubr.bf16.vlgmr.msra.gmra.mrb[8].mxu0 %v489_v24 }
 0x465   :  { %v593_v28 = vpop.f32.mrb[8].mxu0 }
 0x466   :  { %v594_v29 = vadd.f32 %v756_v27, %v593_v28  ;;  %v926_v30 = vpop.f32.mrb[9].mxu0 }
 0x467   :  { %v596_v31 = vpop.f32.mrb[10].mxu0 }
 0x468   :  { %v597_v32 = vadd.f32 %v756_v27, %v596_v31  ;;  %v927_v33 = vpop.f32.mrb[11].mxu0  ;;  %v600_v34 = vmax.f32 %v594_v29, 0.0 }
 0x46a   :  { %v601_v35 = vmax.f32 %v597_v32, 0.0 }
 0x46c   :  { %v602_v36 = vpack.c.bf16 %v601_v35, %v600_v34 }
 0x46e   :  { %945 = vmatmul.mubr.bf16.vlgmr.msra.gmra.mrb[8].mxu1 %v602_v36 }
 0x541   :  { %v706_v37 = vpop.f32.mrb[8].mxu1 }
 0x542   :  { %v707_v38 = vadd.f32 %v765_v0, %v706_v37  ;;  %v946_v39 = vpop.f32.mrb[9].mxu1 }
 0x543   :  { %v709_v40 = vpop.f32.mrb[10].mxu1 }
 0x544   :  { %713 = vst [vmem:[%s1285_s8] sm:$0xff] %v707_v38  ;;  %v710_v41 = vadd.f32 %v765_v0, %v709_v40  ;;  %v947_v42 = vpop.f32.mrb[11].mxu1 }
 0x546   :  { %714 = vst [vmem:[%s1285_s8 + $0x8] sm:$0xff] %v710_v41 }

// kernel: forwardnet_pallas.1
= control target key start
LH: loop header
LB: loop body
LE: loop exit
PB: predicated region body
PF: predicated region fallthrough
CT: control target
= control target key end

     0   :  { %v999_v0 = vmov 0.0   ;;  %vm1000_vm0 = vmmov 0   ;;  %s1277_s1 = inlined_call_operand.vmem [shape: bf16[128,128], index: 1, kind: input, shape index: {}]   ;;  %s1278_s2 = inlined_call_operand.vmem [shape: bf16[128,128], index: 2, kind: input, shape index: {}]   ;;  %s1279_s0 = inlined_call_operand.vmem [shape: bf16[16,128], index: 0, kind: input, shape index: {}]   ;;  %s1280_s3 = inlined_call_operand.vmem [shape: bf16[128,128], index: 3, kind: input, shape index: {}]   ;;  %s1281_s7 = inlined_call_operand.vmem [shape: f32[8,128], index: 7, kind: input, shape index: {}]   ;;  %s1282_s4 = inlined_call_operand.vmem [shape: bf16[128,128], index: 4, kind: input, shape index: {}]   ;;  %s1283_s5 = inlined_call_operand.vmem [shape: bf16[128,128], index: 5, kind: input, shape index: {}]   ;;  %s1284_s6 = inlined_call_operand.vmem [shape: bf16[128,128], index: 6, kind: input, shape index: {}]   ;;  %s1285_s8 = inlined_call_operand.vmem [shape: f32[16,128], index: 8, kind: output, shape index: {}]  }
   0x1   :  { %828 = vmatprep.subr.bf16.mxu0 %v999_v0  ;;  %v950_v1 = vld [vmem:[%s1277_s1] sm:$0xff]   ;;  %844 = vmatprep.mubr.msk.bf16.mxu0 %vm1000_vm0, %v999_v0  ;;  %v951_v2 = vld [vmem:[%s1277_s1 + $0x8] sm:$0xff]   ;;  %v952_v3 = vld [vmem:[%s1277_s1 + $0x10] sm:$0xff]  }
   0x2   :  { %848 = vmatprep.subr.bf16.mxu1 %v999_v0  ;;  %864 = vmatprep.mubr.msk.bf16.mxu1 %vm1000_vm0, %v999_v0  ;;  %v959_v4 = vld [vmem:[%s1278_s2] sm:$0xff]   ;;  %v953_v5 = vld [vmem:[%s1277_s1 + $0x18] sm:$0xff]   ;;  %v960_v6 = vld [vmem:[%s1278_s2 + $0x8] sm:$0xff]  }
   0x3   :  { %829 = vmatpush3.bf16.msra.mxu0 %v950_v1  ;;  %849 = vmatpush3.bf16.msra.mxu1 %v959_v4  ;;  %v954_v7 = vld [vmem:[%s1277_s1 + $0x20] sm:$0xff]   ;;  %v961_v8 = vld [vmem:[%s1278_s2 + $0x10] sm:$0xff]   ;;  %v955_v9 = vld [vmem:[%s1277_s1 + $0x28] sm:$0xff]  }
   0x4   :  { %830 = vmatprep.subr.bf16.mxu0 %v999_v0  ;;  %850 = vmatprep.subr.bf16.mxu1 %v999_v0  ;;  %v962_v10 = vld [vmem:[%s1278_s2 + $0x18] sm:$0xff]   ;;  %v956_v11 = vld [vmem:[%s1277_s1 + $0x30] sm:$0xff]   ;;  %v963_v12 = vld [vmem:[%s1278_s2 + $0x20] sm:$0xff]  }
   0x5   :  { %v957_v13 = vld [vmem:[%s1277_s1 + $0x38] sm:$0xff]   ;;  %v964_v14 = vld [vmem:[%s1278_s2 + $0x28] sm:$0xff]   ;;  %v958_v15 = vld [vmem:[%s1279_s0] sm:$0xff]  }
   0x6   :  { %v965_v16 = vld [vmem:[%s1278_s2 + $0x30] sm:$0xff]   ;;  %v966_v17 = vld [vmem:[%s1278_s2 + $0x38] sm:$0xff]   ;;  %v967_v18 = vld [vmem:[%s1280_s3] sm:$0xff]  }
   0x7   :  { %831 = vmatpush3.bf16.msra.mxu0 %v951_v2  ;;  %851 = vmatpush3.bf16.msra.mxu1 %v960_v6  ;;  %v968_v19 = vld [vmem:[%s1280_s3 + $0x8] sm:$0xff]   ;;  %v969_v20 = vld [vmem:[%s1280_s3 + $0x10] sm:$0xff]   ;;  %v970_v21 = vld [vmem:[%s1280_s3 + $0x18] sm:$0xff]  }
   0x8   :  { %832 = vmatprep.subr.bf16.mxu0 %v999_v0  ;;  %852 = vmatprep.subr.bf16.mxu1 %v999_v0  ;;  %v971_v22 = vld [vmem:[%s1280_s3 + $0x20] sm:$0xff]   ;;  %v972_v23 = vld [vmem:[%s1280_s3 + $0x28] sm:$0xff]   ;;  %v973_v34 = vld [vmem:[%s1280_s3 + $0x30] sm:$0xff]  }
   0x9   :  { %v719_v24 = vld [vmem:[%s1281_s7] ss:$0 sm:$0xff]  ;;  %v974_v35 = vld [vmem:[%s1280_s3 + $0x38] sm:$0xff]   ;;  %v976_v37 = vld [vmem:[%s1282_s4 + $0x8] sm:$0xff]  }
   0xa   :  { %v975_v36 = vld [vmem:[%s1282_s4] sm:$0xff]   ;;  %v977_v38 = vld [vmem:[%s1282_s4 + $0x10] sm:$0xff]   ;;  %v978_v39 = vld [vmem:[%s1282_s4 + $0x18] sm:$0xff]  }
   0xb   :  { %833 = vmatpush3.bf16.msra.mxu0 %v952_v3  ;;  %853 = vmatpush3.bf16.msra.mxu1 %v961_v8  ;;  %v979_v40 = vld [vmem:[%s1282_s4 + $0x20] sm:$0xff]   ;;  %v980_v41 = vld [vmem:[%s1282_s4 + $0x28] sm:$0xff]   ;;  %v981_v52 = vld [vmem:[%s1282_s4 + $0x30] sm:$0xff]  }
   0xc   :  { %834 = vmatprep.subr.bf16.mxu0 %v999_v0  ;;  %854 = vmatprep.subr.bf16.mxu1 %v999_v0  ;;  %v729_v42 = vld [vmem:[%s1281_s7 + $0x1] ss:$0 sm:$0xff]  ;;  %v982_v53 = vld [vmem:[%s1282_s4 + $0x38] sm:$0xff]   ;;  %v984_v55 = vld [vmem:[%s1283_s5 + $0x8] sm:$0xff]  }
   0xd   :  { %v983_v54 = vld [vmem:[%s1283_s5] sm:$0xff]   ;;  %v985_v56 = vld [vmem:[%s1283_s5 + $0x10] sm:$0xff]   ;;  %v986_v57 = vld [vmem:[%s1283_s5 + $0x18] sm:$0xff]  }
   0xe   :  { %v987_v58 = vld [vmem:[%s1283_s5 + $0x20] sm:$0xff]   ;;  %v988_v59 = vld [vmem:[%s1283_s5 + $0x28] sm:$0xff]   ;;  %v990_v8 = vld [vmem:[%s1283_s5 + $0x38] sm:$0xff]  }
   0xf   :  { %835 = vmatpush3.bf16.msra.mxu0 %v953_v5  ;;  %855 = vmatpush3.bf16.msra.mxu1 %v962_v10  ;;  %v738_v60 = vld [vmem:[%s1281_s7 + $0x2] ss:$0 sm:$0xff]  ;;  %v992_v10 = vld [vmem:[%s1284_s6 + $0x8] sm:$0xff]  }
  0x10   :  { %836 = vmatprep.subr.bf16.mxu0 %v999_v0  ;;  %856 = vmatprep.subr.bf16.mxu1 %v999_v0 }
  0x13   :  { %837 = vmatpush3.bf16.msra.mxu0 %v954_v7  ;;  %857 = vmatpush3.bf16.msra.mxu1 %v963_v12  ;;  %v989_v7 = vld [vmem:[%s1283_s5 + $0x30] sm:$0xff]   ;;  %v994_v12 = vld [vmem:[%s1284_s6 + $0x18] sm:$0xff]  }
  0x14   :  { %838 = vmatprep.subr.bf16.mxu0 %v999_v0  ;;  %858 = vmatprep.subr.bf16.mxu1 %v999_v0 }
  0x17   :  { %839 = vmatpush3.bf16.msra.mxu0 %v955_v9  ;;  %859 = vmatpush3.bf16.msra.mxu1 %v964_v14  ;;  %v991_v9 = vld [vmem:[%s1284_s6] sm:$0xff]   ;;  %v996_v14 = vld [vmem:[%s1284_s6 + $0x28] sm:$0xff]  }
  0x18   :  { %840 = vmatprep.subr.bf16.mxu0 %v999_v0  ;;  %860 = vmatprep.subr.bf16.mxu1 %v999_v0 }
  0x1b   :  { %841 = vmatpush3.bf16.msra.mxu0 %v956_v11  ;;  %861 = vmatpush3.bf16.msra.mxu1 %v965_v16  ;;  %v993_v11 = vld [vmem:[%s1284_s6 + $0x10] sm:$0xff]  }
  0x1c   :  { %842 = vmatprep.subr.bf16.mxu0 %v999_v0  ;;  %862 = vmatprep.subr.bf16.mxu1 %v999_v0 }
  0x1f   :  { %843 = vmatpush3.bf16.msra.mxu0 %v957_v13  ;;  %863 = vmatpush3.bf16.msra.mxu1 %v966_v17  ;;  %v995_v13 = vld [vmem:[%s1284_s6 + $0x20] sm:$0xff]  }
  0x20   :  { %868 = vmatprep.subr.bf16.mxu0 %v999_v0  ;;  %888 = vmatprep.subr.bf16.mxu1 %v999_v0 }
  0x22   :  { %845 = vmatmul.mubr.bf16.vlgmr.msra.gmra.mrb[0].mxu0 %v958_v15  ;;  %v747_v15 = vld [vmem:[%s1281_s7 + $0x3] ss:$0 sm:$0xff] }
  0x23   :  { %884 = vmatprep.mubr.msk.bf16.mxu0 %vm1000_vm0, %v999_v0  ;;  %869 = vmatpush3.bf16.msra.mxu0 %v967_v18 }
  0x24   :  { %870 = vmatprep.subr.bf16.mxu0 %v999_v0 }
  0x27   :  { %871 = vmatpush3.bf16.msra.mxu0 %v968_v19 }
  0x28   :  { %872 = vmatprep.subr.bf16.mxu0 %v999_v0 }
  0x2b   :  { %873 = vmatpush3.bf16.msra.mxu0 %v969_v20 }
  0x2c   :  { %874 = vmatprep.subr.bf16.mxu0 %v999_v0 }
  0x2f   :  { %875 = vmatpush3.bf16.msra.mxu0 %v970_v21 }
  0x30   :  { %876 = vmatprep.subr.bf16.mxu0 %v999_v0 }
  0x33   :  { %877 = vmatpush3.bf16.msra.mxu0 %v971_v22 }
  0x34   :  { %878 = vmatprep.subr.bf16.mxu0 %v999_v0 }
  0x37   :  { %879 = vmatpush3.bf16.msra.mxu0 %v972_v23 }
  0x38   :  { %880 = vmatprep.subr.bf16.mxu0 %v999_v0 }
  0x3b   :  { %881 = vmatpush3.bf16.msra.mxu0 %v973_v34 }
  0x3c   :  { %882 = vmatprep.subr.bf16.mxu0 %v999_v0 }
  0x3f   :  { %883 = vmatpush3.bf16.msra.mxu0 %v974_v35 }
  0x40   :  { %908 = vmatprep.subr.bf16.mxu0 %v999_v0 }
  0xf5   :  { %v141_v25 = vpop.f32.mrb[0].mxu0 }
  0xf6   :  { %v142_v26 = vadd.f32 %v719_v24, %v141_v25  ;;  %v846_v27 = vpop.f32.mrb[1].mxu0  ;;  %v997_v25 = vld [vmem:[%s1284_s6 + $0x30] sm:$0xff]  }
  0xf7   :  { %v144_v28 = vpop.f32.mrb[2].mxu0  ;;  %v756_v27 = vld [vmem:[%s1281_s7 + $0x4] ss:$0 sm:$0xff] }
  0xf8   :  { %v145_v29 = vadd.f32 %v719_v24, %v144_v28  ;;  %v847_v30 = vpop.f32.mrb[3].mxu0  ;;  %v148_v31 = vmax.f32 %v142_v26, 0.0  ;;  %v998_v26 = vld [vmem:[%s1284_s6 + $0x38] sm:$0xff]  }
  0xfa   :  { %v149_v32 = vmax.f32 %v145_v29, 0.0 }
  0xfc   :  { %v150_v33 = vpack.c.bf16 %v149_v32, %v148_v31 }
  0xfe   :  { %865 = vmatmul.mubr.bf16.vlgmr.msra.gmra.mrb[0].mxu1 %v150_v33 }
  0xff   :  { %904 = vmatprep.mubr.msk.bf16.mxu1 %vm1000_vm0, %v999_v0  ;;  %889 = vmatpush3.bf16.msra.mxu1 %v975_v36 }
 0x100   :  { %890 = vmatprep.subr.bf16.mxu1 %v999_v0 }
 0x103   :  { %891 = vmatpush3.bf16.msra.mxu1 %v976_v37 }
 0x104   :  { %892 = vmatprep.subr.bf16.mxu1 %v999_v0 }
 0x107   :  { %893 = vmatpush3.bf16.msra.mxu1 %v977_v38 }
 0x108   :  { %894 = vmatprep.subr.bf16.mxu1 %v999_v0 }
 0x10b   :  { %895 = vmatpush3.bf16.msra.mxu1 %v978_v39 }
 0x10c   :  { %896 = vmatprep.subr.bf16.mxu1 %v999_v0 }
 0x10f   :  { %897 = vmatpush3.bf16.msra.mxu1 %v979_v40 }
 0x110   :  { %898 = vmatprep.subr.bf16.mxu1 %v999_v0 }
 0x113   :  { %899 = vmatpush3.bf16.msra.mxu1 %v980_v41 }
 0x114   :  { %900 = vmatprep.subr.bf16.mxu1 %v999_v0 }
 0x117   :  { %901 = vmatpush3.bf16.msra.mxu1 %v981_v52 }
 0x118   :  { %902 = vmatprep.subr.bf16.mxu1 %v999_v0 }
 0x11b   :  { %903 = vmatpush3.bf16.msra.mxu1 %v982_v53 }
 0x11c   :  { %928 = vmatprep.subr.bf16.mxu1 %v999_v0 }
 0x1d1   :  { %v254_v43 = vpop.f32.mrb[0].mxu1 }
 0x1d2   :  { %v255_v44 = vadd.f32 %v729_v42, %v254_v43  ;;  %v866_v45 = vpop.f32.mrb[1].mxu1 }
 0x1d3   :  { %v257_v46 = vpop.f32.mrb[2].mxu1 }
 0x1d4   :  { %v258_v47 = vadd.f32 %v729_v42, %v257_v46  ;;  %v867_v48 = vpop.f32.mrb[3].mxu1  ;;  %v261_v49 = vmax.f32 %v255_v44, 0.0 }
 0x1d6   :  { %v262_v50 = vmax.f32 %v258_v47, 0.0 }
 0x1d8   :  { %v263_v51 = vpack.c.bf16 %v262_v50, %v261_v49 }
 0x1da   :  { %885 = vmatmul.mubr.bf16.vlgmr.msra.gmra.mrb[4].mxu0 %v263_v51 }
 0x1db   :  { %924 = vmatprep.mubr.msk.bf16.mxu0 %vm1000_vm0, %v999_v0  ;;  %909 = vmatpush3.bf16.msra.mxu0 %v983_v54 }
 0x1dc   :  { %910 = vmatprep.subr.bf16.mxu0 %v999_v0 }
 0x1df   :  { %911 = vmatpush3.bf16.msra.mxu0 %v984_v55 }
 0x1e0   :  { %912 = vmatprep.subr.bf16.mxu0 %v999_v0 }
 0x1e3   :  { %913 = vmatpush3.bf16.msra.mxu0 %v985_v56 }
 0x1e4   :  { %914 = vmatprep.subr.bf16.mxu0 %v999_v0 }
 0x1e7   :  { %915 = vmatpush3.bf16.msra.mxu0 %v986_v57 }
 0x1e8   :  { %916 = vmatprep.subr.bf16.mxu0 %v999_v0 }
 0x1eb   :  { %917 = vmatpush3.bf16.msra.mxu0 %v987_v58 }
 0x1ec   :  { %918 = vmatprep.subr.bf16.mxu0 %v999_v0 }
 0x1ef   :  { %919 = vmatpush3.bf16.msra.mxu0 %v988_v59 }
 0x1f0   :  { %920 = vmatprep.subr.bf16.mxu0 %v999_v0 }
 0x1f3   :  { %921 = vmatpush3.bf16.msra.mxu0 %v989_v7 }
 0x1f4   :  { %922 = vmatprep.subr.bf16.mxu0 %v999_v0 }
 0x1f7   :  { %923 = vmatpush3.bf16.msra.mxu0 %v990_v8 }
 0x2ad   :  { %v367_v61 = vpop.f32.mrb[4].mxu0 }
 0x2ae   :  { %v368_v62 = vadd.f32 %v738_v60, %v367_v61  ;;  %v886_v63 = vpop.f32.mrb[5].mxu0 }
 0x2af   :  { %v370_v1 = vpop.f32.mrb[6].mxu0 }
 0x2b0   :  { %v371_v2 = vadd.f32 %v738_v60, %v370_v1  ;;  %v887_v3 = vpop.f32.mrb[7].mxu0  ;;  %v374_v4 = vmax.f32 %v368_v62, 0.0 }
 0x2b2   :  { %v375_v5 = vmax.f32 %v371_v2, 0.0 }
 0x2b4   :  { %v376_v6 = vpack.c.bf16 %v375_v5, %v374_v4 }
 0x2b6   :  { %905 = vmatmul.mubr.bf16.vlgmr.msra.gmra.mrb[4].mxu1 %v376_v6 }
 0x2b7   :  { %944 = vmatprep.mubr.msk.bf16.mxu1 %vm1000_vm0, %v999_v0  ;;  %929 = vmatpush3.bf16.msra.mxu1 %v991_v9 }
 0x2b8   :  { %930 = vmatprep.subr.bf16.mxu1 %v999_v0 }
 0x2bb   :  { %931 = vmatpush3.bf16.msra.mxu1 %v992_v10 }
 0x2bc   :  { %932 = vmatprep.subr.bf16.mxu1 %v999_v0 }
 0x2bf   :  { %933 = vmatpush3.bf16.msra.mxu1 %v993_v11 }
 0x2c0   :  { %934 = vmatprep.subr.bf16.mxu1 %v999_v0 }
 0x2c3   :  { %935 = vmatpush3.bf16.msra.mxu1 %v994_v12 }
 0x2c4   :  { %936 = vmatprep.subr.bf16.mxu1 %v999_v0 }
 0x2c7   :  { %937 = vmatpush3.bf16.msra.mxu1 %v995_v13 }
 0x2c8   :  { %938 = vmatprep.subr.bf16.mxu1 %v999_v0 }
 0x2cb   :  { %939 = vmatpush3.bf16.msra.mxu1 %v996_v14 }
 0x2cc   :  { %940 = vmatprep.subr.bf16.mxu1 %v999_v0 }
 0x2cf   :  { %941 = vmatpush3.bf16.msra.mxu1 %v997_v25 }
 0x2d0   :  { %942 = vmatprep.subr.bf16.mxu1 %v999_v0  ;;  %v765_v0 = vld [vmem:[%s1281_s7 + $0x5] ss:$0 sm:$0xff] }
 0x2d3   :  { %943 = vmatpush3.bf16.msra.mxu1 %v998_v26 }
 0x389   :  { %v480_v16 = vpop.f32.mrb[4].mxu1 }
 0x38a   :  { %v481_v17 = vadd.f32 %v747_v15, %v480_v16  ;;  %v906_v18 = vpop.f32.mrb[5].mxu1 }
 0x38b   :  { %v483_v19 = vpop.f32.mrb[6].mxu1 }
 0x38c   :  { %v484_v20 = vadd.f32 %v747_v15, %v483_v19  ;;  %v907_v21 = vpop.f32.mrb[7].mxu1  ;;  %v487_v22 = vmax.f32 %v481_v17, 0.0 }
 0x38e   :  { %v488_v23 = vmax.f32 %v484_v20, 0.0 }
 0x390   :  { %v489_v24 = vpack.c.bf16 %v488_v23, %v487_v22 }
 0x392   :  { %925 = vmatmul.mubr.bf16.vlgmr.msra.gmra.mrb[8].mxu0 %v489_v24 }
 0x465   :  { %v593_v28 = vpop.f32.mrb[8].mxu0 }
 0x466   :  { %v594_v29 = vadd.f32 %v756_v27, %v593_v28  ;;  %v926_v30 = vpop.f32.mrb[9].mxu0 }
 0x467   :  { %v596_v31 = vpop.f32.mrb[10].mxu0 }
 0x468   :  { %v597_v32 = vadd.f32 %v756_v27, %v596_v31  ;;  %v927_v33 = vpop.f32.mrb[11].mxu0  ;;  %v600_v34 = vmax.f32 %v594_v29, 0.0 }
 0x46a   :  { %v601_v35 = vmax.f32 %v597_v32, 0.0 }
 0x46c   :  { %v602_v36 = vpack.c.bf16 %v601_v35, %v600_v34 }
 0x46e   :  { %945 = vmatmul.mubr.bf16.vlgmr.msra.gmra.mrb[8].mxu1 %v602_v36 }
 0x541   :  { %v706_v37 = vpop.f32.mrb[8].mxu1 }
 0x542   :  { %v707_v38 = vadd.f32 %v765_v0, %v706_v37  ;;  %v946_v39 = vpop.f32.mrb[9].mxu1 }
 0x543   :  { %v709_v40 = vpop.f32.mrb[10].mxu1 }
 0x544   :  { %713 = vst [vmem:[%s1285_s8] sm:$0xff] %v707_v38  ;;  %v710_v41 = vadd.f32 %v765_v0, %v709_v40  ;;  %v947_v42 = vpop.f32.mrb[11].mxu1 }
 0x546   :  { %714 = vst [vmem:[%s1285_s8 + $0x8] sm:$0xff] %v710_v41 }

</bundles_post_ra>
